<compile_context>
chip_gen: v6e
topology: v6e:2x2x1
jax: 0.10.0
libtpu: 0.0.40
codegen_flags: <defaults>
</compile_context>

<pallas_src>
import functools
import math

import jax
import jax.numpy as jnp
from jax import lax
from jax.experimental import pallas as pl
from jax.experimental.pallas import tpu as pltpu


# ----------------------------- small helpers --------------------------------

def _pair(v):
    return (v, v) if isinstance(v, int) else tuple(v)


def _cdiv(a, b):
    return -(-a // b)


def _round_up(x, m):
    return _cdiv(x, m) * m


def _vmem_budget_bytes():
    """~75% of this generation's per-core VMEM (headroom for Mosaic scratch)."""
    cap = 64 * 1024 * 1024            # conservative default (v7x per-TC VMEM)
    try:
        info = pltpu.get_tpu_info()
        cap = int(getattr(info, "vmem_capacity_bytes", cap))
    except Exception:                 # API unavailable -> keep conservative cap
        pass
    return (cap * 3) // 4


# ------------------------------- kernels -------------------------------------

def _gemm_bias_kernel(p_ref, w_ref, b_ref, o_ref):
    # p_ref: (M_blk, K_pad)  im2col patches (lane-dense)
    # w_ref: (K_pad, O_blk)  weight column block
    # b_ref: (1, O_blk)      f32 bias
    # o_ref: (M_blk, O_blk)  lane-dense output block
    acc = jnp.dot(p_ref[...], w_ref[...], preferred_element_type=jnp.float32)
    o_ref[...] = (acc + b_ref[...]).astype(o_ref.dtype)


def _conv_tap_kernel(x_ref, w_ref, b_ref, o_ref, *, KH, KW, C, Ho, Wo,
                     sh, sw, dh, dw):
    # x_ref: (B_blk, Hp, Wp, C)   zero-padded NHWC input block
    # w_ref: (KH*KW*C, O_blk)     im2col-ordered weight column block
    # b_ref: (1, O_blk)           f32 bias
    # o_ref: (B_blk, Ho, Wo, O_blk)
    B_blk, _, _, O_blk = o_ref.shape
    M = B_blk * Ho * Wo
    acc = jnp.zeros((M, O_blk), jnp.float32)
    t = 0
    for kh in range(KH):                      # static 3x3-style unroll
        for kw in range(KW):
            # Windowed load straight from the ref (no full-tile load/concat).
            tap = x_ref[:, pl.ds(kh * dh, (Ho - 1) * sh + 1),
                        pl.ds(kw * dw, (Wo - 1) * sw + 1), :]
            if sh > 1 or sw > 1:
                tap = tap[:, ::sh, ::sw, :]
            w_tap = w_ref[pl.ds(t * C, C), :]
            acc = acc + jnp.dot(tap.reshape(M, C), w_tap,
                                preferred_element_type=jnp.float32)
            t += 1
    acc = acc + b_ref[...]
    o_ref[...] = acc.reshape(B_blk, Ho, Wo, O_blk).astype(o_ref.dtype)


# ------------------------------- wrapper --------------------------------------

def conv2d_shift_forward(x, weight, bias=None, stride=(1, 1), padding=(0, 0),
                         dilation=(1, 1), groups=1, compute_dtype=None):
    """Forward of Conv2dShift (padding_mode='zeros'): conv2d(x, weight, bias).

    compute_dtype: optionally cast matmul operands (e.g. jnp.bfloat16) while
    keeping f32 accumulation; default None matches F.conv2d numerics.
    """
    assert groups == 1  # TODO(synk): grouped convolution not implemented in kernel
    sh, sw = _pair(stride)
    ph, pw = _pair(padding)
    dh, dw = _pair(dilation)
    N, C, H, W = x.shape
    O, Cin, KH, KW = weight.shape
    assert Cin == C

    Ho = (H + 2 * ph - dh * (KH - 1) - 1) // sh + 1
    Wo = (W + 2 * pw - dw * (KW - 1) - 1) // sw + 1
    Hp, Wp = H + 2 * ph, W + 2 * pw

    out_dtype = x.dtype
    op_dtype = jnp.dtype(compute_dtype) if compute_dtype is not None else jnp.dtype(x.dtype)
    isz = op_dtype.itemsize
    osz = jnp.dtype(out_dtype).itemsize

    Kdim = KH * KW * C
    O_pad = _round_up(O, 128)
    O_blk = 256 if O_pad % 256 == 0 else 128   # MXU-native N width (v6e/v7x)
    n_o = O_pad // O_blk

    # Weight im2col order (kh, kw, c) -> rows of (KH*KW*C, O); bias kept f32.
    w2 = jnp.transpose(weight, (2, 3, 1, 0)).reshape(Kdim, O).astype(op_dtype)
    if bias is None:
        b2 = jnp.zeros((1, O_pad), jnp.float32)
    else:
        b2 = jnp.pad(bias.reshape(1, O).astype(jnp.float32),
                     ((0, 0), (0, O_pad - O)))

    vmem_limit = _vmem_budget_bytes()
    tile_budget = (vmem_limit * 4) // 5
    # Grid-invariant weight/bias: single pipeline buffer (reclaims VMEM).
    w_mode = pl.Buffered(1) if n_o == 1 else None

    # Zero-padded NHWC activation (XLA fuses the transpose + pad; on the GEMM
    # path it fuses further into the tap gather below).
    # TODO(synk): fold the zero padding into the tap-path kernel as a masked
    # halo to save this extra HBM pass.
    x_nhwc = jnp.pad(jnp.transpose(x, (0, 2, 3, 1)),
                     ((0, 0), (ph, ph), (pw, pw), (0, 0))).astype(op_dtype)

    flops = 2 * N * Ho * Wo * Kdim * O

    if C < 64:
        # ---------- small-C path: wrapper-side im2col + tiled GEMM ----------
        K_pad = _round_up(Kdim, 128)
        taps = []
        for kh in range(KH):
            for kw in range(KW):
                taps.append(lax.slice(
                    x_nhwc,
                    (0, kh * dh, kw * dw, 0),
                    (N, kh * dh + (Ho - 1) * sh + 1,
                     kw * dw + (Wo - 1) * sw + 1, C),
                    (1, sh, sw, 1)))
        patches = jnp.concatenate(taps, axis=-1).reshape(N * Ho * Wo, Kdim)
        M = N * Ho * Wo

        w_p = jnp.pad(w2, ((0, K_pad - Kdim), (0, O_pad - O)))

        w_bufs = 1 if n_o == 1 else 2

        def step_bytes(m_blk):
            return (2 * m_blk * K_pad * isz          # double-buffered patches
                    + 2 * m_blk * O_blk * osz        # double-buffered output
                    + w_bufs * K_pad * O_blk * isz   # weight
                    + 2 * O_blk * 4                  # bias
                    + m_blk * O_blk * 4)             # f32 accumulator

        # Largest M block that fits the VMEM budget ...
        m_cap = min(4096, _round_up(M, 8))
        M_blk = 8
        for cand in (8, 16, 32, 64, 128, 256, 512, 1024, 2048, 4096):
            if cand <= m_cap and step_bytes(cand) <= tile_budget:
                M_blk = cand
        n_m = max(1, _cdiv(M, M_blk))
        # ... but keep >=2 parallel grid steps (v7x: 2 TensorCores).
        if n_m * n_o < 2 and M > 8:
            n_m = 2
        M_blk = _round_up(_cdiv(M, n_m), 8)
        M_pad = n_m * M_blk

        patches = jnp.pad(patches, ((0, M_pad - M), (0, K_pad - Kdim)))

        bytes_accessed = (M_pad * K_pad * isz + K_pad * O_pad * isz
                          + O_pad * 4 + M_pad * O_pad * osz)

        out2d = pl.pallas_call(
            _gemm_bias_kernel,
            out_shape=jax.ShapeDtypeStruct((M_pad, O_pad), out_dtype),
            grid_spec=pltpu.PrefetchScalarGridSpec(
                num_scalar_prefetch=0,
                grid=(n_m, n_o),
                in_specs=[
                    pl.BlockSpec((M_blk, K_pad), lambda i, j: (i, 0)),
                    pl.BlockSpec((K_pad, O_blk), lambda i, j: (0, j),
                                 pipeline_mode=w_mode),
                    pl.BlockSpec((1, O_blk), lambda i, j: (0, j),
                                 pipeline_mode=w_mode),
                ],
                out_specs=pl.BlockSpec((M_blk, O_blk), lambda i, j: (i, j)),
            ),
            compiler_params=pltpu.CompilerParams(
                dimension_semantics=("parallel", "parallel"),
                vmem_limit_bytes=vmem_limit),
            cost_estimate=pl.CostEstimate(flops=flops, transcendentals=0,
                                          bytes_accessed=bytes_accessed),
        )(patches, w_p, b2)

        out = out2d[:M, :O].reshape(N, Ho, Wo, O)
    else:
        # ---------- large-C path: in-kernel per-tap windowed accumulation ----
        w_p = jnp.pad(w2, ((0, 0), (0, O_pad - O)))

        w_bufs = 1 if n_o == 1 else 2

        def step_bytes(b_blk):
            m = b_blk * Ho * Wo
            return (2 * b_blk * Hp * Wp * C * isz    # double-buffered input
                    + 2 * m * O_blk * osz            # double-buffered output
                    + w_bufs * Kdim * O_blk * isz    # weight
                    + 2 * O_blk * 4                  # bias
                    + m * O_blk * 4                  # f32 accumulator
                    + m * C * (4 + isz))             # per-tap operand headroom

        # Largest batch block (divisor of N) fitting the budget, then shrink to
        # guarantee >=2 parallel grid steps when possible.
        # TODO(synk): spatial (Ho) tiling for images too large for one block.
        divisors = [d for d in range(1, N + 1) if N % d == 0]
        fitting = [d for d in divisors if step_bytes(d) <= tile_budget]
        B_blk = fitting[-1] if fitting else 1
        if (N // B_blk) * n_o < 2:
            smaller = [d for d in fitting if d < B_blk]
            if smaller:
                B_blk = smaller[-1]
        n_b = N // B_blk

        bytes_accessed = (N * Hp * Wp * C * isz + Kdim * O_pad * isz
                          + O_pad * 4 + N * Ho * Wo * O_pad * osz)

        kernel = functools.partial(_conv_tap_kernel, KH=KH, KW=KW, C=C,
                                   Ho=Ho, Wo=Wo, sh=sh, sw=sw, dh=dh, dw=dw)
        out4 = pl.pallas_call(
            kernel,
            out_shape=jax.ShapeDtypeStruct((N, Ho, Wo, O_pad), out_dtype),
            grid_spec=pltpu.PrefetchScalarGridSpec(
                num_scalar_prefetch=0,
                grid=(n_b, n_o),
                in_specs=[
                    pl.BlockSpec((B_blk, Hp, Wp, C), lambda n, j: (n, 0, 0, 0)),
                    pl.BlockSpec((Kdim, O_blk), lambda n, j: (0, j),
                                 pipeline_mode=w_mode),
                    pl.BlockSpec((1, O_blk), lambda n, j: (0, j),
                                 pipeline_mode=w_mode),
                ],
                out_specs=pl.BlockSpec((B_blk, Ho, Wo, O_blk),
                                       lambda n, j: (n, 0, 0, j)),
            ),
            compiler_params=pltpu.CompilerParams(
                dimension_semantics=("parallel", "parallel"),
                vmem_limit_bytes=vmem_limit),
            cost_estimate=pl.CostEstimate(flops=flops, transcendentals=0,
                                          bytes_accessed=bytes_accessed),
        )(x_nhwc, w_p, b2)

        out = out4[..., :O]

    return jnp.transpose(out, (0, 3, 1, 2))   # NHWC -> NCHW


# --------------------------------- test ---------------------------------------

if __name__ == "__main__":
    def _run_case(key, N, C, H, W, O, k, stride, padding, dilation):
        kx, kw_, kb = jax.random.split(key, 3)
        x = jax.random.normal(kx, (N, C, H, W), dtype=jnp.float32)
        # Deterministic kaiming-uniform-style init (a=sqrt(5) -> 1/sqrt(fan_in))
        fan_in = C * k * k
        bound = 1.0 / math.sqrt(fan_in)
        weight = jax.random.uniform(kw_, (O, C, k, k), jnp.float32, -bound, bound)
        bias = jax.random.uniform(kb, (O,), jnp.float32, -bound, bound)

        out = conv2d_shift_forward(x, weight, bias, stride, padding, dilation)
        out = jax.block_until_ready(out)

        ref = lax.conv_general_dilated(
            x, weight, window_strides=_pair(stride),
            padding=[(p, p) for p in _pair(padding)],
            rhs_dilation=_pair(dilation),
            dimension_numbers=("NCHW", "OIHW", "NCHW")) + bias[None, :, None, None]
        assert out.shape == ref.shape
        assert jnp.allclose(out, ref, rtol=1e-5, atol=1e-5)

    key = jax.random.PRNGKey(0)
    k1, k2 = jax.random.split(key)
    # Small-C (GEMM) path: Conv2dShift(4, 8, 3, padding=1) on (2, 4, 16, 16).
    _run_case(k1, N=2, C=4, H=16, W=16, O=8, k=3, stride=1, padding=1, dilation=1)
    # Large-C (in-kernel tap) path: Conv2dShift(64, 16, 3, padding=1) on (2, 64, 8, 8).
    _run_case(k2, N=2, C=64, H=8, W=8, O=16, k=3, stride=1, padding=1, dilation=1)

    print("KERNEL_OK")
</pallas_src>

<mosaic_0001>
module attributes {stable_mosaic.version = 11 : i64} {
  func.func @_gemm_bias_kernel(%arg0: i32, %arg1: i32, %arg2: memref<256x128xf32, #tpu.memory_space<vmem>>, %arg3: memref<128x128xf32, #tpu.memory_space<vmem>>, %arg4: memref<1x128xf32, #tpu.memory_space<vmem>>, %arg5: memref<256x128xf32, #tpu.memory_space<vmem>>) attributes {dimension_semantics = [#tpu.dimension_semantics<parallel>, #tpu.dimension_semantics<parallel>], iteration_bounds = array<i64: 2, 1>, scalar_prefetch = 0 : i64, scratch_operands = 0 : i64, tpu.core_type = #tpu.core_type<tc>, window_params = [{transform_indices = @transform_0, window_bounds = array<i64: 256, 128>}, {pipeline_mode = #tpu.pipeline_mode<synchronous>, transform_indices = @transform_1, window_bounds = array<i64: 128, 128>}, {pipeline_mode = #tpu.pipeline_mode<synchronous>, transform_indices = @transform_2, window_bounds = array<i64: 1, 128>}, {transform_indices = @transform_3, window_bounds = array<i64: 256, 128>}]} {
    %c0 = arith.constant 0 : index
    %c0_0 = arith.constant 0 : index
    %0 = vector.load %arg2[%c0, %c0_0] : memref<256x128xf32, #tpu.memory_space<vmem>>, vector<256x128xf32>
    %c0_1 = arith.constant 0 : index
    %c0_2 = arith.constant 0 : index
    %1 = vector.load %arg3[%c0_1, %c0_2] : memref<128x128xf32, #tpu.memory_space<vmem>>, vector<128x128xf32>
    %cst = arith.constant dense<0.000000e+00> : vector<256x128xf32>
    %2 = tpu.matmul %0, %1, %cst {dimension_numbers = #tpu.dot_dimension_numbers<[1], [0], [0], [1], [0, 0, 1, 1], [], []>} : vector<256x128xf32>, vector<128x128xf32>, vector<256x128xf32> -> vector<256x128xf32>
    %c0_3 = arith.constant 0 : index
    %c0_4 = arith.constant 0 : index
    %3 = vector.load %arg4[%c0_3, %c0_4] : memref<1x128xf32, #tpu.memory_space<vmem>>, vector<1x128xf32>
    %4 = vector.broadcast %3 : vector<1x128xf32> to vector<256x128xf32>
    %5 = arith.addf %2, %4 : vector<256x128xf32>
    %c0_5 = arith.constant 0 : index
    %c0_6 = arith.constant 0 : index
    %6 = vector.load %arg5[%c0_5, %c0_6] : memref<256x128xf32, #tpu.memory_space<vmem>>, vector<256x128xf32>
    tpu.vector_store %arg5[%c0_5, %c0_6], %5 {strides = array<i32>} : memref<256x128xf32, #tpu.memory_space<vmem>>, vector<256x128xf32>,
    return
  }
  func.func @transform_0(%arg0: i32, %arg1: i32) -> (i32, i32) {
    %c0_i32 = arith.constant 0 : i32
    %c0_i32_0 = arith.constant 0 : i32
    return %arg0, %c0_i32 : i32, i32
  }
  func.func @transform_1(%arg0: i32, %arg1: i32) -> (i32, i32) {
    %c0_i32 = arith.constant 0 : i32
    %c0_i32_0 = arith.constant 0 : i32
    return %c0_i32, %arg1 : i32, i32
  }
  func.func @transform_2(%arg0: i32, %arg1: i32) -> (i32, i32) {
    %c0_i32 = arith.constant 0 : i32
    %c0_i32_0 = arith.constant 0 : i32
    return %c0_i32, %arg1 : i32, i32
  }
  func.func @transform_3(%arg0: i32, %arg1: i32) -> (i32, i32) {
    %c0_i32 = arith.constant 0 : i32
    return %arg0, %arg1 : i32, i32
  }
}

</mosaic_0001>

<bundles_post_ra>
// kernel: tpu_custom_call.1
= control target key start
LH: loop header
LB: loop body
LE: loop exit
PB: predicated region body
PF: predicated region fallthrough
CT: control target
= control target key end

     0   :  { %8 = vsyncpa [#allocation3], 0  ;;  %s1397_s0 = inlined_call_operand.hbm [shape: f32[512,128], index: 0, kind: input, shape index: {}]   ;;  %s1398_s1 = inlined_call_operand.hbm [shape: f32[128,128], index: 1, kind: input, shape index: {}]   ;;  %s1399_s2 = inlined_call_operand.vmem [shape: f32[1,128], index: 2, kind: input, shape index: {}]   ;;  %s1400_s3 = inlined_call_operand.hbm [shape: f32[512,128], index: 3, kind: output, shape index: {}]  }
   0x1   :  { %10 = vsyncpa [#allocation3 + $0x1], 0 }
   0x2   :  { %11 = vsyncpa [#allocation6], 0 }
   0x3   :  { %12 = vsyncpa [#allocation4], 0 }
   0x4   :  { %14 = vsyncpa [#allocation4 + $0x1], 0  ;;  %s1100_s12 = smov 0   ;;  %s1102_s13 = smov 0  }
   0x5   :  { %s1104_s14 = smov 0   ;;  %s1106_s15 = smov 0  }
   0x6   :  { %s1108_s16 = smov 0   ;;  %s1110_s17 = smov 0  }
   0x7 LB: > { %s675_s18 = sadd.s32 4294967295, %s1071_s17   ;;  %s676_s19 = sadd.s32 4294967294, %s1071_s17   ;;  %s1071_s17 = sphi %s1110_s17, %s20_s17   ;;  %s1067_s16 = sphi %s1108_s16, %s1422_s16   ;;  %s1063_s15 = sphi %s1106_s15, %s1421_s15   ;;  %s1059_s14 = sphi %s1104_s14, %s1420_s14   ;;  %s1055_s13 = sphi %s1102_s13, %s1419_s13   ;;  %s1051_s12 = sphi %s1100_s12, %s1418_s12  }
   0x8   : > { %p52_p0 = scmp.ne.s32.totalorder %s1055_s13, %s1051_s12  ;;  %p1134_p1 = scmp.eq.s32.totalorder %s675_s18, 0 }
   0x9   : > { %p1138_p2 = scmp.eq.s32.totalorder %s675_s18, 1  ;;  %p136_p3 = scmp.eq.s32.totalorder %s676_s19, 1 }
   0xa   : > { %p1144_p4 = por %p1134_p1, %p52_p0  ;;  %p677_p5 = scmp.ge.s32.totalorder %s1071_s17, 1 }
   0xb   : > { %p1149_p6 = por %p136_p3, %p52_p0  ;;  %p143_p7 = scmp.lt.s32.totalorder %s1071_s17, 3 }
   0xc   : > { %s1406_s22 = scalar_select %p1144_p4, 1, 0 }
   0xd   : > { %s1407_s23 = scalar_select %p1149_p6, 1, 0 }
   0xe   : > { %p1154_p8 = pnand %p677_p5, %p143_p7  ;;  %s1073_s25 = smov [#allocation5]  }
   0xf   : > { %s157_s26 = sshll.u32 %s1073_s25, 4  ;;  %s32_s28 = sadd.s32 1, %s1067_s16  ;;  %s158_s26 = int_to_ptr.vmem [resolvable:$true] %s157_s26 }
  0x10   : > { %p864_p9 = pneg %p1154_p8  ;;  %s944_s29 = scalar_lea.vmem %s158_s26, 2048 }
  0x11   : > { %p945_p13 = scmp.ne.s32.totalorder %s158_s26, %s944_s29  ;;  %p952_p5 = scmp.lt.s32.totalorder %s158_s26, %s158_s26 }
  0x12   : > { %p1163_p11 = pnand %p864_p9, %p1134_p1  ;;  %p953_p7 = scmp.lt.s32.totalorder %s944_s29, %s944_s29 }
  0x14   : > { %p935_p12 = pneg %p1163_p11  ;;  %p954_p6 = por %p953_p7, %p952_p5 }
  0x16   : > { %p947_p0 = pnand %p945_p13, %p935_p12 }
  0x18   : > { %p948_p3 = pneg %p947_p0 }
  0x1a   : > { %p955_p4 = pnand %p954_p6, %p948_p3 }
  0x1c   : > { %958 = shalt.err (!%p955_p4)
}
  0x1d   : > { %s1402_s30 = smov 128   ;;  %s1403_s4 = smov 8  }
  0x1e   : > { %867 = dma.hbm_to_vmem [thread:$0]  (!%p1163_p11), %s1398_s1, 2048, %s158_s26, [#allocation6], %s1402_s30, %s1402_s30, %s1403_s4  }
  0x1f   : > { %p34_p4 = scmp.ge.s32.totalorder %s32_s28, 2  ;;  %s39_s7 = sadd.s32 1, %s1059_s14 }
  0x20   : > { %p46_p6 = scmp.ne.s32.totalorder %s1059_s14, %s1055_s13  ;;  %p47_p9 = scmp.eq.s32.totalorder %s1071_s17, 0 }
  0x21   : > { %s1424_s28 = smov (%p34_p4, %s32_s28), 0  ;;  %p877_p0 = scmp.lt.s32.totalorder %s1071_s17, 2 }
  0x22   : > { %p1184_p12 = por %p47_p9, %p46_p6  ;;  %p1190_p13 = por %p1138_p2, %p46_p6 }
  0x23   : > { %s36_s10 = ssub.s32 %s1067_s16, %s1424_s28  ;;  %s177_s11 = sand.u32 1, %s1059_s14  }
  0x24   : > { %p37_p11 = scmp.eq.s32.totalorder %s36_s10, 0  ;;  %s681_s18 = sshll.u32 %s177_s11, 8 }
  0x25   : > { %s694_s25 = sshll.u32 %s1067_s16, 12  ;;  %s181_s5 = scalar_lea.vmem [#allocation2], %s681_s18 }
  0x26   : > { %s1199_s19 = scalar_select %p37_p11, %s1059_s14, %s39_s7  }
  0x27   : > { %s187_s29 = scalar_lea.hbm %s1397_s0, %s694_s25  ;;  %s188_s6 = sshll.u32 %s181_s5, 4  ;;  %s189_s6 = int_to_ptr.vmem [resolvable:$true] %s188_s6 }
  0x28   : > { %p1207_p2 = pnand %p877_p0, %p1184_p12  ;;  %s178_s30 = scalar_lea.sflag [#allocation3], %s177_s11 }
  0x29   : > { %s972_s10 = scalar_lea.vmem %s189_s6, 4096  ;;  %s1076_s7 = smov [#allocation2]  }
  0x2a   : > { %p961_p3 = pneg %p1207_p2  ;;  %p973_p5 = scmp.ne.s32.totalorder %s189_s6, %s972_s10 }
  0x2b   : > { %s977_s4 = sshll.u32 %s1076_s7, 4  ;;  %s978_s4 = int_to_ptr.vmem [resolvable:$false] %s977_s4 }
  0x2c   : > { %p975_p7 = pnand %p973_p5, %p961_p3  ;;  %s979_s25 = scalar_lea.vmem %s978_s4, 8192 }
  0x2d   : > { %p980_p6 = scmp.lt.s32.totalorder %s189_s6, %s978_s4  ;;  %p981_p9 = scmp.lt.s32.totalorder %s979_s25, %s972_s10 }
  0x2e   : > { %p976_p4 = pneg %p975_p7 }
  0x2f   : > { %p982_p11 = por %p981_p9, %p980_p6 }
  0x31   : > { %p983_p10 = pnand %p982_p11, %p976_p4 }
  0x33   : > { %986 = shalt.err (!%p983_p10)
}
  0x34   : > { %s1413_s8 = smov 8   ;;  %s1414_s18 = smov 128  }
  0x35   : > { %871 = dma.hbm_to_vmem [thread:$0]  (!%p1207_p2), %s187_s29, 4096, %s189_s6, %s178_s30, %s1414_s18, %s1414_s18, %s1413_s8  }
  0x36   : > { %200 = sbr.rel (%p1154_p8) target bundleno = 335 (0x14f), region = 32  ;;  %s1221_s11 = sand.u32 (!%p1154_p8), 1, %s1055_s13  }
  0x37   : > { %s685_s4 = sshll.u32 (!%p1154_p8), %s1221_s11, 8  ;;  %s203_s26 = scalar_lea.sflag (!%p1154_p8), [#allocation3], %s1221_s11 }
  0x38   : > { %s1227_s27 = scalar_lea.vmem (!%p1154_p8), [#allocation2], %s685_s4  ;;  %p1415_p10 = scmp.ne.s32.totalorder (!%p1154_p8), %s1406_s22, 0 }
  0x3b   : > { %1038 = dma.done.wait (%p1415_p10), %s203_s26, 4096  }
  0x3c   : > { %1040 = vsyncadd (%p1415_p10), %s203_s26, 4294963200 }
  0x3d   : > { %1042 = dma.done.wait (%p1134_p1), [#allocation6], 2048  }
  0x3e   : > { %1044 = vsyncadd (%p1134_p1), [#allocation6], 4294965248  ;;  %v288_v0 = vld [vmem:[#allocation5 + $0x78] sm:$0xff]  ;;  %v287_v1 = vld [vmem:[#allocation5 + $0x70] sm:$0xff]  ;;  %s1278_s24 = scalar_lea.vmem [#allocation7], %s685_s4  ;;  %s695_s30 = sshll.u32 %s1063_s15, 12 }
  0x3f   : > { %744 = vmatprep.subr.mxu0 %v288_v0  ;;  %824 = vmatprep.subr.mxu1 %v288_v0  ;;  %v286_v2 = vld [vmem:[#allocation5 + $0x68] sm:$0xff]  ;;  %v285_v3 = vld [vmem:[#allocation5 + $0x60] sm:$0xff]  ;;  %v284_v4 = vld [vmem:[#allocation5 + $0x58] sm:$0xff]  ;;  %s568_s29 = sshll.u32 %s1278_s24, 4  ;;  %s1341_s21 = scalar_lea.hbm %s1400_s3, %s695_s30  ;;  %s1343_s29 = int_to_ptr.vmem [resolvable:$true] %s568_s29 }
  0x40   : > { %745 = vmatpush3.msra.mxu0 %v288_v0  ;;  %840 = vmatpush3.msra.mxu1 %v288_v0  ;;  %v283_v5 = vld [vmem:[#allocation5 + $0x50] sm:$0xff]  ;;  %v282_v6 = vld [vmem:[#allocation5 + $0x48] sm:$0xff]  ;;  %v281_v7 = vld [vmem:[#allocation5 + $0x40] sm:$0xff]  ;;  %s554_s15 = scalar_lea.sflag [#allocation4], %s1221_s11  ;;  %s987_s10 = scalar_lea.vmem %s1343_s29, 4096 }
  0x41   : > { %746 = vmatprep.subr.mxu0 %v287_v1  ;;  %825 = vmatprep.subr.mxu1 %v287_v1  ;;  %v280_v8 = vld [vmem:[#allocation5 + $0x38] sm:$0xff]  ;;  %v279_v9 = vld [vmem:[#allocation5 + $0x30] sm:$0xff]  ;;  %v278_v10 = vld [vmem:[#allocation5 + $0x28] sm:$0xff]  ;;  %p988_p1 = scmp.ne.s32.totalorder %s1343_s29, %s987_s10  ;;  %s1077_s7 = smov [#allocation7]  }
  0x42   : > { %747 = vmatpush3.msra.mxu0 %v287_v1  ;;  %841 = vmatpush3.msra.mxu1 %v287_v1  ;;  %v277_v11 = vld [vmem:[#allocation5 + $0x20] sm:$0xff]  ;;  %v276_v12 = vld [vmem:[#allocation5 + $0x18] sm:$0xff]  ;;  %v275_v13 = vld [vmem:[#allocation5 + $0x10] sm:$0xff]  ;;  %s991_s25 = sshll.u32 %s1077_s7, 4  ;;  %s992_s25 = int_to_ptr.vmem [resolvable:$false] %s991_s25 }
  0x43   : > { %748 = vmatprep.subr.mxu0 %v286_v2  ;;  %826 = vmatprep.subr.mxu1 %v286_v2  ;;  %v274_v14 = vld [vmem:[#allocation5 + $0x8] sm:$0xff]  ;;  %v273_v15 = vld [vmem:[#allocation5] sm:$0xff]  ;;  %v243_v20 = vld [vmem:[%s1227_s27 + $0x10] sm:$0xff]  ;;  %p989_p8 = pnand %p988_p1, %p1190_p13  ;;  %s993_s8 = scalar_lea.vmem %s992_s25, 8192 }
  0x44   : > { %749 = vmatpush3.msra.mxu0 %v286_v2  ;;  %842 = vmatpush3.msra.mxu1 %v286_v2  ;;  %v241_v16 = vld [vmem:[%s1227_s27] sm:$0xff]  ;;  %v242_v18 = vld [vmem:[%s1227_s27 + $0x8] sm:$0xff]  ;;  %v259_v21 = vld [vmem:[%s1227_s27 + $0x90] sm:$0xff]  ;;  %p994_p0 = scmp.lt.s32.totalorder %s1343_s29, %s992_s25  ;;  %p995_p2 = scmp.lt.s32.totalorder %s993_s8, %s987_s10 }
  0x45   : > { %750 = vmatprep.subr.mxu0 %v285_v3  ;;  %827 = vmatprep.subr.mxu1 %v285_v3  ;;  %v257_v17 = vld [vmem:[%s1227_s27 + $0x80] sm:$0xff]  ;;  %v258_v19 = vld [vmem:[%s1227_s27 + $0x88] sm:$0xff]  ;;  %v244_v22 = vld [vmem:[%s1227_s27 + $0x18] sm:$0xff]  ;;  %p990_p12 = pneg %p989_p8 }
  0x46   : > { %751 = vmatpush3.msra.mxu0 %v285_v3  ;;  %843 = vmatpush3.msra.mxu1 %v285_v3  ;;  %v260_v23 = vld [vmem:[%s1227_s27 + $0x98] sm:$0xff]  ;;  %v245_v24 = vld [vmem:[%s1227_s27 + $0x20] sm:$0xff]  ;;  %v246_v26 = vld [vmem:[%s1227_s27 + $0x28] sm:$0xff]  ;;  %p996_p3 = por %p995_p2, %p994_p0 }
  0x47   : > { %752 = vmatprep.subr.mxu0 %v284_v4  ;;  %828 = vmatprep.subr.mxu1 %v284_v4  ;;  %v261_v25 = vld [vmem:[%s1227_s27 + $0xa0] sm:$0xff]  ;;  %v262_v27 = vld [vmem:[%s1227_s27 + $0xa8] sm:$0xff]  ;;  %v247_v28 = vld [vmem:[%s1227_s27 + $0x30] sm:$0xff] }
  0x48   : > { %753 = vmatpush3.msra.mxu0 %v284_v4  ;;  %844 = vmatpush3.msra.mxu1 %v284_v4  ;;  %v263_v29 = vld [vmem:[%s1227_s27 + $0xb0] sm:$0xff]  ;;  %v248_v30 = vld [vmem:[%s1227_s27 + $0x38] sm:$0xff]  ;;  %v249_v32 = vld [vmem:[%s1227_s27 + $0x40] sm:$0xff]  ;;  %p997_p5 = pnand %p996_p3, %p990_p12 }
  0x49   : > { %754 = vmatprep.subr.mxu0 %v283_v5  ;;  %829 = vmatprep.subr.mxu1 %v283_v5  ;;  %v264_v31 = vld [vmem:[%s1227_s27 + $0xb8] sm:$0xff]  ;;  %v265_v33 = vld [vmem:[%s1227_s27 + $0xc0] sm:$0xff]  ;;  %v250_v34 = vld [vmem:[%s1227_s27 + $0x48] sm:$0xff] }
  0x4a   : > { %755 = vmatpush3.msra.mxu0 %v283_v5  ;;  %845 = vmatpush3.msra.mxu1 %v283_v5  ;;  %v266_v35 = vld [vmem:[%s1227_s27 + $0xc8] sm:$0xff]  ;;  %v251_v36 = vld [vmem:[%s1227_s27 + $0x50] sm:$0xff]  ;;  %v252_v38 = vld [vmem:[%s1227_s27 + $0x58] sm:$0xff] }
  0x4b   : > { %756 = vmatprep.subr.mxu0 %v282_v6  ;;  %830 = vmatprep.subr.mxu1 %v282_v6  ;;  %v267_v37 = vld [vmem:[%s1227_s27 + $0xd0] sm:$0xff]  ;;  %v268_v39 = vld [vmem:[%s1227_s27 + $0xd8] sm:$0xff]  ;;  %v253_v40 = vld [vmem:[%s1227_s27 + $0x60] sm:$0xff] }
  0x4c   : > { %757 = vmatpush3.msra.mxu0 %v282_v6  ;;  %846 = vmatpush3.msra.mxu1 %v282_v6  ;;  %v269_v41 = vld [vmem:[%s1227_s27 + $0xe0] sm:$0xff]  ;;  %v254_v42 = vld [vmem:[%s1227_s27 + $0x68] sm:$0xff]  ;;  %v255_v44 = vld [vmem:[%s1227_s27 + $0x70] sm:$0xff] }
  0x4d   : > { %758 = vmatprep.subr.mxu0 %v281_v7  ;;  %831 = vmatprep.subr.mxu1 %v281_v7  ;;  %v270_v43 = vld [vmem:[%s1227_s27 + $0xe8] sm:$0xff]  ;;  %v271_v45 = vld [vmem:[%s1227_s27 + $0xf0] sm:$0xff]  ;;  %v256_v46 = vld [vmem:[%s1227_s27 + $0x78] sm:$0xff] }
  0x4e   : > { %759 = vmatpush3.msra.mxu0 %v281_v7  ;;  %847 = vmatpush3.msra.mxu1 %v281_v7  ;;  %v272_v47 = vld [vmem:[%s1227_s27 + $0xf8] sm:$0xff]  ;;  %v1272_v48 = vld [vmem:[%s1399_s2] ss:$0 sm:$0xff] }
  0x4f   : > { %760 = vmatprep.subr.mxu0 %v280_v8  ;;  %832 = vmatprep.subr.mxu1 %v280_v8 }
  0x50   : > { %761 = vmatpush3.msra.mxu0 %v280_v8  ;;  %848 = vmatpush3.msra.mxu1 %v280_v8 }
  0x51   : > { %762 = vmatprep.subr.mxu0 %v279_v9  ;;  %833 = vmatprep.subr.mxu1 %v279_v9 }
  0x52   : > { %763 = vmatpush3.msra.mxu0 %v279_v9  ;;  %849 = vmatpush3.msra.mxu1 %v279_v9 }
  0x53   : > { %764 = vmatprep.subr.mxu0 %v278_v10  ;;  %834 = vmatprep.subr.mxu1 %v278_v10 }
  0x54   : > { %765 = vmatpush3.msra.mxu0 %v278_v10  ;;  %850 = vmatpush3.msra.mxu1 %v278_v10 }
  0x55   : > { %766 = vmatprep.subr.mxu0 %v277_v11  ;;  %835 = vmatprep.subr.mxu1 %v277_v11 }
  0x56   : > { %767 = vmatpush3.msra.mxu0 %v277_v11  ;;  %851 = vmatpush3.msra.mxu1 %v277_v11 }
  0x57   : > { %768 = vmatprep.subr.mxu0 %v276_v12  ;;  %836 = vmatprep.subr.mxu1 %v276_v12 }
  0x58   : > { %769 = vmatpush3.msra.mxu0 %v276_v12  ;;  %852 = vmatpush3.msra.mxu1 %v276_v12 }
  0x59   : > { %770 = vmatprep.subr.mxu0 %v275_v13  ;;  %837 = vmatprep.subr.mxu1 %v275_v13 }
  0x5a   : > { %771 = vmatpush3.msra.mxu0 %v275_v13  ;;  %853 = vmatpush3.msra.mxu1 %v275_v13 }
  0x5b   : > { %772 = vmatprep.subr.mxu0 %v274_v14  ;;  %838 = vmatprep.subr.mxu1 %v274_v14 }
  0x5c   : > { %773 = vmatpush3.msra.mxu0 %v274_v14  ;;  %854 = vmatpush3.msra.mxu1 %v274_v14 }
  0x5d   : > { %774 = vmatprep.subr.mxu0 %v273_v15  ;;  %839 = vmatprep.subr.mxu1 %v273_v15 }
  0x5e   : > { %775 = vmatpush3.msra.mxu0 %v273_v15  ;;  %855 = vmatpush3.msra.mxu1 %v273_v15 }
  0x5f   : > { %776 = vmatprep.mubr.f32.mxu0 %v241_v16  ;;  %800 = vmatprep.mubr.f32.mxu1 %v257_v17 }
  0x60   : > { %777 = vmatmul.mubr.f32.vlgmr.msra.gmra.mxu0 %v242_v18  ;;  %801 = vmatmul.mubr.f32.vlgmr.msra.gmra.mxu1 %v258_v19 }
  0x61   : > { %779 = vmatprep.mubr.f32.mxu0 %v243_v20  ;;  %803 = vmatprep.mubr.f32.mxu1 %v259_v21 }
  0x64   : > { %780 = vmatmul.mubr.f32.gmra.mxu0 %v244_v22  ;;  %804 = vmatmul.mubr.f32.gmra.mxu1 %v260_v23 }
  0x65   : > { %782 = vmatprep.mubr.f32.mxu0 %v245_v24  ;;  %806 = vmatprep.mubr.f32.mxu1 %v261_v25 }
  0x68   : > { %783 = vmatmul.mubr.f32.gmra.mxu0 %v246_v26  ;;  %807 = vmatmul.mubr.f32.gmra.mxu1 %v262_v27 }
  0x69   : > { %785 = vmatprep.mubr.f32.mxu0 %v247_v28  ;;  %809 = vmatprep.mubr.f32.mxu1 %v263_v29 }
  0x6c   : > { %786 = vmatmul.mubr.f32.gmra.mxu0 %v248_v30  ;;  %810 = vmatmul.mubr.f32.gmra.mxu1 %v264_v31 }
  0x6d   : > { %788 = vmatprep.mubr.f32.mxu0 %v249_v32  ;;  %812 = vmatprep.mubr.f32.mxu1 %v265_v33 }
  0x70   : > { %789 = vmatmul.mubr.f32.gmra.mxu0 %v250_v34  ;;  %813 = vmatmul.mubr.f32.gmra.mxu1 %v266_v35 }
  0x71   : > { %791 = vmatprep.mubr.f32.mxu0 %v251_v36  ;;  %815 = vmatprep.mubr.f32.mxu1 %v267_v37 }
  0x74   : > { %792 = vmatmul.mubr.f32.gmra.mxu0 %v252_v38  ;;  %816 = vmatmul.mubr.f32.gmra.mxu1 %v268_v39 }
  0x75   : > { %794 = vmatprep.mubr.f32.mxu0 %v253_v40  ;;  %818 = vmatprep.mubr.f32.mxu1 %v269_v41 }
  0x78   : > { %795 = vmatmul.mubr.f32.gmra.mxu0 %v254_v42  ;;  %819 = vmatmul.mubr.f32.gmra.mxu1 %v270_v43 }
  0x79   : > { %797 = vmatprep.mubr.f32.mxu0 %v255_v44  ;;  %821 = vmatprep.mubr.f32.mxu1 %v271_v45 }
  0x7c   : > { %798 = vmatmul.mubr.f32.gmra.mxu0 %v256_v46  ;;  %822 = vmatmul.mubr.f32.gmra.mxu1 %v272_v47 }
 0x120   : > { %v778_v49 = vpop.f32.mrf.mxu0  ;;  %v802_v50 = vpop.f32.mrf.mxu1 }
 0x121   : > { %v368_v51 = vadd.f32 %v778_v49, %v1272_v48  ;;  %v448_v52 = vadd.f32 %v802_v50, %v1272_v48 }
 0x122   : > { %v362_v53 = vpop.f32.mrf.mxu0  ;;  %v442_v54 = vpop.f32.mrf.mxu1 }
 0x123   : > { %522 = vst [vmem:[%s1278_s24 + $0x8] sm:$0xff] %v368_v51  ;;  %538 = vst [vmem:[%s1278_s24 + $0x88] sm:$0xff] %v448_v52  ;;  %v363_v55 = vadd.f32 %v1272_v48, %v362_v53  ;;  %v443_v56 = vadd.f32 %v1272_v48, %v442_v54 }
 0x124   : > { %v781_v57 = vpop.f32.mrf.mxu0  ;;  %v805_v58 = vpop.f32.mrf.mxu1 }
 0x125   : > { %521 = vst [vmem:[%s1278_s24] sm:$0xff] %v363_v55  ;;  %537 = vst [vmem:[%s1278_s24 + $0x80] sm:$0xff] %v443_v56  ;;  %v378_v59 = vadd.f32 %v781_v57, %v1272_v48  ;;  %v458_v60 = vadd.f32 %v805_v58, %v1272_v48 }
 0x126   : > { %v372_v61 = vpop.f32.mrf.mxu0  ;;  %v452_v62 = vpop.f32.mrf.mxu1 }
 0x127   : > { %524 = vst [vmem:[%s1278_s24 + $0x18] sm:$0xff] %v378_v59  ;;  %540 = vst [vmem:[%s1278_s24 + $0x98] sm:$0xff] %v458_v60  ;;  %v373_v63 = vadd.f32 %v1272_v48, %v372_v61  ;;  %v453_v0 = vadd.f32 %v1272_v48, %v452_v62 }
 0x128   : > { %v784_v1 = vpop.f32.mrf.mxu0  ;;  %v808_v2 = vpop.f32.mrf.mxu1 }
 0x129   : > { %523 = vst [vmem:[%s1278_s24 + $0x10] sm:$0xff] %v373_v63  ;;  %539 = vst [vmem:[%s1278_s24 + $0x90] sm:$0xff] %v453_v0  ;;  %v388_v3 = vadd.f32 %v784_v1, %v1272_v48  ;;  %v468_v4 = vadd.f32 %v808_v2, %v1272_v48 }
 0x12a   : > { %v382_v5 = vpop.f32.mrf.mxu0  ;;  %v462_v6 = vpop.f32.mrf.mxu1 }
 0x12b   : > { %526 = vst [vmem:[%s1278_s24 + $0x28] sm:$0xff] %v388_v3  ;;  %542 = vst [vmem:[%s1278_s24 + $0xa8] sm:$0xff] %v468_v4  ;;  %v383_v7 = vadd.f32 %v1272_v48, %v382_v5  ;;  %v463_v8 = vadd.f32 %v1272_v48, %v462_v6 }
 0x12c   : > { %v787_v9 = vpop.f32.mrf.mxu0  ;;  %v811_v10 = vpop.f32.mrf.mxu1 }
 0x12d   : > { %525 = vst [vmem:[%s1278_s24 + $0x20] sm:$0xff] %v383_v7  ;;  %541 = vst [vmem:[%s1278_s24 + $0xa0] sm:$0xff] %v463_v8  ;;  %v398_v11 = vadd.f32 %v787_v9, %v1272_v48  ;;  %v478_v12 = vadd.f32 %v811_v10, %v1272_v48 }
 0x12e   : > { %v392_v13 = vpop.f32.mrf.mxu0  ;;  %v472_v14 = vpop.f32.mrf.mxu1 }
 0x12f   : > { %528 = vst [vmem:[%s1278_s24 + $0x38] sm:$0xff] %v398_v11  ;;  %544 = vst [vmem:[%s1278_s24 + $0xb8] sm:$0xff] %v478_v12  ;;  %v393_v15 = vadd.f32 %v1272_v48, %v392_v13  ;;  %v473_v16 = vadd.f32 %v1272_v48, %v472_v14 }
 0x130   : > { %v790_v17 = vpop.f32.mrf.mxu0  ;;  %v814_v18 = vpop.f32.mrf.mxu1 }
 0x131   : > { %527 = vst [vmem:[%s1278_s24 + $0x30] sm:$0xff] %v393_v15  ;;  %543 = vst [vmem:[%s1278_s24 + $0xb0] sm:$0xff] %v473_v16  ;;  %v408_v19 = vadd.f32 %v790_v17, %v1272_v48  ;;  %v488_v20 = vadd.f32 %v814_v18, %v1272_v48 }
 0x132   : > { %v402_v21 = vpop.f32.mrf.mxu0  ;;  %v482_v22 = vpop.f32.mrf.mxu1 }
 0x133   : > { %530 = vst [vmem:[%s1278_s24 + $0x48] sm:$0xff] %v408_v19  ;;  %546 = vst [vmem:[%s1278_s24 + $0xc8] sm:$0xff] %v488_v20  ;;  %v403_v23 = vadd.f32 %v1272_v48, %v402_v21  ;;  %v483_v24 = vadd.f32 %v1272_v48, %v482_v22 }
 0x134   : > { %v793_v25 = vpop.f32.mrf.mxu0  ;;  %v817_v26 = vpop.f32.mrf.mxu1 }
 0x135   : > { %529 = vst [vmem:[%s1278_s24 + $0x40] sm:$0xff] %v403_v23  ;;  %545 = vst [vmem:[%s1278_s24 + $0xc0] sm:$0xff] %v483_v24  ;;  %v418_v27 = vadd.f32 %v793_v25, %v1272_v48  ;;  %v498_v28 = vadd.f32 %v817_v26, %v1272_v48 }
 0x136   : > { %v412_v29 = vpop.f32.mrf.mxu0  ;;  %v492_v30 = vpop.f32.mrf.mxu1 }
 0x137   : > { %532 = vst [vmem:[%s1278_s24 + $0x58] sm:$0xff] %v418_v27  ;;  %548 = vst [vmem:[%s1278_s24 + $0xd8] sm:$0xff] %v498_v28  ;;  %v413_v31 = vadd.f32 %v1272_v48, %v412_v29  ;;  %v493_v32 = vadd.f32 %v1272_v48, %v492_v30 }
 0x138   : > { %v796_v33 = vpop.f32.mrf.mxu0  ;;  %v820_v34 = vpop.f32.mrf.mxu1 }
 0x139   : > { %531 = vst [vmem:[%s1278_s24 + $0x50] sm:$0xff] %v413_v31  ;;  %547 = vst [vmem:[%s1278_s24 + $0xd0] sm:$0xff] %v493_v32  ;;  %v428_v35 = vadd.f32 %v796_v33, %v1272_v48  ;;  %v508_v36 = vadd.f32 %v820_v34, %v1272_v48 }
 0x13a   : > { %v422_v37 = vpop.f32.mrf.mxu0  ;;  %v502_v38 = vpop.f32.mrf.mxu1 }
 0x13b   : > { %534 = vst [vmem:[%s1278_s24 + $0x68] sm:$0xff] %v428_v35  ;;  %550 = vst [vmem:[%s1278_s24 + $0xe8] sm:$0xff] %v508_v36  ;;  %v423_v39 = vadd.f32 %v1272_v48, %v422_v37  ;;  %v503_v40 = vadd.f32 %v1272_v48, %v502_v38 }
 0x13c   : > { %v799_v41 = vpop.f32.mrf.mxu0  ;;  %v823_v42 = vpop.f32.mrf.mxu1 }
 0x13d   : > { %533 = vst [vmem:[%s1278_s24 + $0x60] sm:$0xff] %v423_v39  ;;  %549 = vst [vmem:[%s1278_s24 + $0xe0] sm:$0xff] %v503_v40  ;;  %v438_v43 = vadd.f32 %v799_v41, %v1272_v48  ;;  %v518_v44 = vadd.f32 %v823_v42, %v1272_v48 }
 0x13e   : > { %v432_v45 = vpop.f32.mrf.mxu0  ;;  %v512_v46 = vpop.f32.mrf.mxu1 }
 0x13f   : > { %536 = vst [vmem:[%s1278_s24 + $0x78] sm:$0xff] %v438_v43  ;;  %552 = vst [vmem:[%s1278_s24 + $0xf8] sm:$0xff] %v518_v44  ;;  %v433_v47 = vadd.f32 %v1272_v48, %v432_v45  ;;  %v513_v49 = vadd.f32 %v1272_v48, %v512_v46 }
 0x141   : > { %535 = vst [vmem:[%s1278_s24 + $0x70] sm:$0xff] %v433_v47  ;;  %551 = vst [vmem:[%s1278_s24 + $0xf0] sm:$0xff] %v513_v49 }
 0x142   : > { %1000 = shalt.err (!%p997_p5)
}
 0x143   : > { %s1001_s18 = scalar_lea.hbm %s1341_s21, 4096  ;;  %s1005_s27 = scalar_lea.hbm %s1400_s3, 8192 }
 0x144   : > { %p1002_p7 = scmp.ne.s32.totalorder %s1341_s21, %s1001_s18  ;;  %p1006_p9 = scmp.lt.s32.totalorder %s1341_s21, %s1400_s3 }
 0x145   : > { %p1007_p11 = scmp.lt.s32.totalorder %s1005_s27, %s1001_s18 }
 0x146   : > { %p1003_p4 = pnand %p1002_p7, %p1190_p13 }
 0x147   : > { %p1008_p10 = por %p1007_p11, %p1006_p9 }
 0x148   : > { %p1004_p6 = pneg %p1003_p4 }
 0x14a   : > { %p1009_p1 = pnand %p1008_p10, %p1004_p6 }
 0x14c   : > { %1012 = shalt.err (!%p1009_p1)
}
 0x14d   : > { %s1078_s24 = smov 128   ;;  %s1079_s30 = smov 8  }
 0x14e   : > { %862 = dma.vmem_to_hbm [thread:$0]  (%p1190_p13), %s1343_s29, 4096, %s1341_s21, %s554_s15, %s1078_s24, %s1078_s24, %s1079_s30  }
 0x14f PF: > { %s583_s5 = sand.u32 1, %s1051_s12   ;;  %p1416_p8 = scmp.ne.s32.totalorder %s1407_s23, 0 }
 0x150   : > { %p1417_p12 = scmp.ge.s32.totalorder %s1071_s17, 2  ;;  %s584_s6 = scalar_lea.sflag [#allocation4], %s583_s5 }
 0x152   : > { %p873_p0 = pnand %p1417_p12, %p1416_p8 }
 0x154   : > { %p874_p2 = pneg %p873_p0 }
 0x156   : > { %1046 = dma.done.wait (%p874_p2), %s584_s6, 4096  }
 0x157   : > { %1048 = vsyncadd (%p874_p2), %s584_s6, 4294963200  ;;  %s20_s17 = sadd.s32 1, %s1071_s17   ;;  %s1418_s12 = smov %s1055_s13 }
 0x158   : > { %p17_p3 = scmp.ge.s32.totalorder %s20_s17, 4   ;;  %s1419_s13 = smov %s1059_s14 }
 0x159   : > { %s1420_s14 = smov %s1199_s19  ;;  %s1421_s15 = smov %s1067_s16 }
 0x15a   : > { %s1422_s16 = smov %s1424_s28  ;;  %19 = sbr.rel (!%p17_p3) target bundleno = 7 (0x7), region = 85 }
 0x15f   :  { %589 = vsyncpa [#allocation3], 1 }
 0x160   :  { %591 = vsyncpa [#allocation3 + $0x1], 1 }
 0x161   :  { %592 = vsyncpa [#allocation6], 1 }
 0x162   :  { %593 = vsyncpa [#allocation4], 1 }
 0x163   :  { %595 = vsyncpa [#allocation4 + $0x1], 1 }

</bundles_post_ra>
